<compile_context>
chip_gen: v7x
topology: tpu7x:2x2x1
jax: 0.10.0
libtpu: 0.0.40
codegen_flags: <defaults>
</compile_context>

<pallas_src>
import jax
import jax.numpy as jnp
from jax.experimental import pallas as pl
from jax.experimental.pallas import tpu as pltpu


def _conv_mm_kernel(p_ref, w_ref, b_ref, o_ref):
    # p_ref : (KKCp, tile_cols)   im2col patches, lane axis = N*Hout*Wout tile
    # w_ref : (Cout, KKCp)        flattened (and zero-padded) conv weights
    # b_ref : (Cout, 1)
    # o_ref : (Cout, tile_cols)   lane-dense output (spatial*batch on lanes)
    acc = jnp.dot(w_ref[...], p_ref[...], preferred_element_type=jnp.float32)
    o_ref[...] = (acc + b_ref[...]).astype(o_ref.dtype)


def _pick_col_tile(nhw):
    # One block when small (per-grid-step overhead would dominate); otherwise
    # a lane-dense multiple-of-128 tile that keeps the patch block far inside
    # v7x's 64 MiB VMEM while staying in the >=512-lane HBM-roofline regime.
    if nhw <= 4096:
        return nhw
    for t in (4096, 2048, 1024, 512, 256, 128):
        if nhw % t == 0:
            return t
    return nhw  # ragged large NHW: fall back to a single full block


def conv_layer_forward(x_nchw, weight, bias, *, stride, compute_dtype=None):
    """Equivalent of ConvLayer.forward (== nn.Conv2d with padding=k//2).

    x_nchw : (N, Cin, H, W)         float32
    weight : (Cout, Cin, K, K)      float32  (PyTorch OIHW layout)
    bias   : (Cout,)                float32
    returns: (N, Cout, Hout, Wout)  float32
    """
    N, Cin, H, W = x_nchw.shape
    Cout, _, K, _ = weight.shape
    pad = K // 2
    Hout = (H + 2 * pad - K) // stride + 1
    Wout = (W + 2 * pad - K) // stride + 1
    HW = Hout * Wout
    NHW = N * HW
    KKC = K * K * Cin
    KKCp = ((KKC + 7) // 8) * 8          # sublane-align the contraction dim

    # ---- wrapper-side layout plumbing (plain XLA, kept out of the kernel) ----
    x_pad = jnp.pad(x_nchw, ((0, 0), (0, 0), (pad, pad), (pad, pad)))
    # (Cin, N, Hpad, Wpad): makes the flattened column index = n*HW + h*Wout + w
    x_cn = jnp.transpose(x_pad, (1, 0, 2, 3))
    taps = []
    for kh in range(K):
        for kw in range(K):
            taps.append(
                x_cn[:, :,
                     kh:kh + stride * (Hout - 1) + 1:stride,
                     kw:kw + stride * (Wout - 1) + 1:stride])  # (Cin,N,Hout,Wout)
    # (K*K, Cin, N, Hout, Wout) -> (K*K*Cin, N*HW); row index (kh*K+kw)*Cin + c
    patches = jnp.stack(taps, axis=0).reshape(KKC, NHW)
    patches = jnp.pad(patches, ((0, KKCp - KKC), (0, 0)))
    # (Cout, Cin, K, K) -> (Cout, K, K, Cin) -> (Cout, KKC); same row ordering.
    w2 = jnp.transpose(weight, (0, 2, 3, 1)).reshape(Cout, KKC)
    w2 = jnp.pad(w2, ((0, 0), (0, KKCp - KKC)))
    b2 = bias.reshape(Cout, 1)

    if compute_dtype is not None:           # e.g. jnp.bfloat16 for v6e/v7x MXU
        patches = patches.astype(compute_dtype)
        w2 = w2.astype(compute_dtype)

    tile_cols = _pick_col_tile(NHW)
    grid = (NHW // tile_cols,)

    out_flat = pl.pallas_call(
        _conv_mm_kernel,
        out_shape=jax.ShapeDtypeStruct((Cout, NHW), x_nchw.dtype),
        grid_spec=pltpu.PrefetchScalarGridSpec(
            num_scalar_prefetch=0,
            grid=grid,
            in_specs=[
                pl.BlockSpec((KKCp, tile_cols), lambda j: (0, j)),
                pl.BlockSpec((Cout, KKCp), lambda j: (0, 0)),   # constant: reused
                pl.BlockSpec((Cout, 1), lambda j: (0, 0)),      # constant: reused
            ],
            out_specs=pl.BlockSpec((Cout, tile_cols), lambda j: (0, j)),
        ),
        compiler_params=pltpu.CompilerParams(
            dimension_semantics=("parallel",)),
    )(patches, w2, b2)

    # (Cout, N*HW) -> (N, Cout, Hout, Wout): cheap XLA layout plumbing.
    return jnp.transpose(out_flat.reshape(Cout, N, Hout, Wout), (1, 0, 2, 3))


def _reference_conv(x, weight, bias, *, stride, K):
    ref = jax.lax.conv_general_dilated(
        x, weight, window_strides=(stride, stride),
        padding=[(K // 2, K // 2)] * 2,
        dimension_numbers=("NCHW", "OIHW", "NCHW"))
    return ref + bias[None, :, None, None]


def _make_params(key, in_channels, out_channels, kernel_size):
    kw, kb = jax.random.split(key)
    fan_in = in_channels * kernel_size * kernel_size
    bound = 1.0 / (fan_in ** 0.5)
    weight = jax.random.uniform(
        kw, (out_channels, in_channels, kernel_size, kernel_size),
        minval=-bound, maxval=bound, dtype=jnp.float32)
    bias = jax.random.uniform(kb, (out_channels,),
                              minval=-bound, maxval=bound, dtype=jnp.float32)
    return weight, bias


if __name__ == "__main__":
    # ConvLayer(in_channels=4, out_channels=8, kernel_size=3, stride=1)
    in_channels, out_channels = 4, 8
    N, H, W = 2, 16, 16

    key = jax.random.PRNGKey(0)
    kx, kp = jax.random.split(key)
    x = jax.random.normal(kx, (N, in_channels, H, W), dtype=jnp.float32)

    # Primary case: K=3, stride=1 (the module's canonical config).
    K, stride = 3, 1
    weight, bias = _make_params(kp, in_channels, out_channels, K)
    out = jax.block_until_ready(conv_layer_forward(x, weight, bias, stride=stride))
    ref = _reference_conv(x, weight, bias, stride=stride, K=K)
    assert out.shape == (N, out_channels, H, W)
    assert jnp.allclose(out, ref, atol=1e-4, rtol=1e-4)

    # stride > 1 coverage.
    K, stride = 3, 2
    weight, bias = _make_params(jax.random.fold_in(kp, 1), in_channels,
                                out_channels, K)
    out = jax.block_until_ready(conv_layer_forward(x, weight, bias, stride=stride))
    ref = _reference_conv(x, weight, bias, stride=stride, K=K)
    assert out.shape == ref.shape
    assert jnp.allclose(out, ref, atol=1e-4, rtol=1e-4)

    # Even kernel size coverage (ragged N*HW lane extent).
    K, stride = 4, 1
    weight, bias = _make_params(jax.random.fold_in(kp, 2), in_channels,
                                out_channels, K)
    out = jax.block_until_ready(conv_layer_forward(x, weight, bias, stride=stride))
    ref = _reference_conv(x, weight, bias, stride=stride, K=K)
    assert out.shape == ref.shape
    assert jnp.allclose(out, ref, atol=1e-4, rtol=1e-4)

    print("KERNEL_OK")
</pallas_src>

<mosaic_0001>
module attributes {stable_mosaic.version = 11 : i64} {
  func.func @_conv_mm_kernel(%arg0: i32, %arg1: memref<40x512xf32, #tpu.memory_space<vmem>>, %arg2: memref<8x40xf32, #tpu.memory_space<vmem>>, %arg3: memref<8x1xf32, #tpu.memory_space<vmem>>, %arg4: memref<8x512xf32, #tpu.memory_space<vmem>>) attributes {dimension_semantics = [#tpu.dimension_semantics<parallel>], iteration_bounds = array<i64: 1>, scalar_prefetch = 0 : i64, scratch_operands = 0 : i64, tpu.core_type = #tpu.core_type<tc>, window_params = [{transform_indices = @transform_0, window_bounds = array<i64: 40, 512>}, {pipeline_mode = #tpu.pipeline_mode<synchronous>, transform_indices = @transform_1, window_bounds = array<i64: 8, 40>}, {pipeline_mode = #tpu.pipeline_mode<synchronous>, transform_indices = @transform_2, window_bounds = array<i64: 8, 1>}, {transform_indices = @transform_3, window_bounds = array<i64: 8, 512>}]} {
    %c0 = arith.constant 0 : index
    %c0_0 = arith.constant 0 : index
    %0 = vector.load %arg2[%c0, %c0_0] : memref<8x40xf32, #tpu.memory_space<vmem>>, vector<8x40xf32>
    %c0_1 = arith.constant 0 : index
    %c0_2 = arith.constant 0 : index
    %1 = vector.load %arg1[%c0_1, %c0_2] : memref<40x512xf32, #tpu.memory_space<vmem>>, vector<40x512xf32>
    %cst = arith.constant dense<0.000000e+00> : vector<8x512xf32>
    %2 = tpu.matmul %0, %1, %cst {dimension_numbers = #tpu.dot_dimension_numbers<[1], [0], [0], [1], [0, 0, 1, 1], [], []>} : vector<8x40xf32>, vector<40x512xf32>, vector<8x512xf32> -> vector<8x512xf32>
    %c0_3 = arith.constant 0 : index
    %c0_4 = arith.constant 0 : index
    %3 = vector.load %arg3[%c0_3, %c0_4] : memref<8x1xf32, #tpu.memory_space<vmem>>, vector<8x1xf32>
    %4 = vector.broadcast %3 : vector<8x1xf32> to vector<8x512xf32>
    %5 = arith.addf %2, %4 : vector<8x512xf32>
    %c0_5 = arith.constant 0 : index
    %c0_6 = arith.constant 0 : index
    %6 = vector.load %arg4[%c0_5, %c0_6] : memref<8x512xf32, #tpu.memory_space<vmem>>, vector<8x512xf32>
    tpu.vector_store %arg4[%c0_5, %c0_6], %5 {strides = array<i32>} : memref<8x512xf32, #tpu.memory_space<vmem>>, vector<8x512xf32>,
    return
  }
  func.func @transform_0(%arg0: i32) -> (i32, i32) {
    %c0_i32 = arith.constant 0 : i32
    %c0_i32_0 = arith.constant 0 : i32
    return %c0_i32, %arg0 : i32, i32
  }
  func.func @transform_1(%arg0: i32) -> (i32, i32) {
    %c0_i32 = arith.constant 0 : i32
    %c0_i32_0 = arith.constant 0 : i32
    %c0_i32_1 = arith.constant 0 : i32
    return %c0_i32, %c0_i32_0 : i32, i32
  }
  func.func @transform_2(%arg0: i32) -> (i32, i32) {
    %c0_i32 = arith.constant 0 : i32
    %c0_i32_0 = arith.constant 0 : i32
    %c0_i32_1 = arith.constant 0 : i32
    return %c0_i32, %c0_i32_0 : i32, i32
  }
  func.func @transform_3(%arg0: i32) -> (i32, i32) {
    %c0_i32 = arith.constant 0 : i32
    %c0_i32_0 = arith.constant 0 : i32
    return %c0_i32, %arg0 : i32, i32
  }
}

</mosaic_0001>

<bundles_post_ra>
// kernel: tpu_custom_call.1
= control target key start
LH: loop header
LB: loop body
LE: loop exit
PB: predicated region body
PF: predicated region fallthrough
CT: control target
= control target key end

     0   :  { %8 = vsyncpa [#allocation3], 0  ;;  %s350_s0 = inlined_call_operand.hbm [shape: f32[40,512], index: 0, kind: input, shape index: {}]   ;;  %s351_s1 = inlined_call_operand.vmem [shape: f32[8,40], index: 1, kind: input, shape index: {}]   ;;  %s352_s2 = inlined_call_operand.vmem [shape: f32[8,1], index: 2, kind: input, shape index: {}]   ;;  %s353_s3 = inlined_call_operand.hbm [shape: f32[8,512], index: 3, kind: output, shape index: {}]  }
   0x1   :  { %9 = vsyncpa [#allocation4], 0  ;;  %s294_s12 = smov [#allocation2]   ;;  %s246_s16 = scalar_lea.hbm %s350_s0, 2560 }
   0x2   :  { %s15_s13 = sshll.u32 %s294_s12, 4  ;;  %p247_p0 = scmp.ne.s32.totalorder %s350_s0, %s246_s16  ;;  %s16_s13 = int_to_ptr.vmem [resolvable:$true] %s15_s13 }
   0x3   :  { %p250_p1 = scmp.lt.u32.totalorder %s246_s16, %s350_s0 }
   0x5   :  { %p252_p2 = pnand %p250_p1, %p247_p0 }
   0x7   :  { %255 = shalt.err (!%p252_p2)
}
   0x8   :  { %s256_s21 = scalar_lea.vmem %s16_s13, 2560  ;;  %p261_p4 = scmp.lt.s32.totalorder %s16_s13, %s16_s13 }
   0x9   :  { %p257_p3 = scmp.ne.s32.totalorder %s16_s13, %s256_s21  ;;  %p262_p5 = scmp.lt.s32.totalorder %s256_s21, %s256_s21 }
   0xb   :  { %p263_p6 = por %p262_p5, %p261_p4 }
   0xd   :  { %p264_p7 = pnand %p263_p6, %p257_p3 }
   0xf   :  { %267 = shalt.err (!%p264_p7)
}
  0x10   :  { %s295_s22 = smov 512   ;;  %s296_s23 = smov 32  }
  0x11   :  { %21 = dma.hbm_to_vmem [thread:$0]  %s350_s0, 2560, %s16_s13, [#allocation3], %s295_s22, %s295_s22, %s296_s23  }
  0x12   :  { %290 = dma.done.wait [#allocation3], 2560  }
  0x13   :  { %291 = vsyncadd [#allocation3], 4294964736  ;;  %v297_v0 = vmov 0.0   ;;  %v298_v1 = vmov 0   ;;  %v31_v2 = vld [vmem:[#allocation2 + $0x8] sm:$0xff]  ;;  %v33_v4 = vld [vmem:[#allocation2 + $0x18] sm:$0xff] }
  0x14   :  { %124 = vmatprep.mubr.f32.mxu0 %v297_v0  ;;  %195 = vmatprep.mubr.f32.mxu1 %v297_v0  ;;  %v35_v3 = vld [vmem:[#allocation2 + $0x28] sm:$0xff]  ;;  %v37_v6 = vld [vmem:[#allocation2 + $0x38] sm:$0xff]  ;;  %v30_v7 = vld [vmem:[#allocation2] sm:$0xff]  ;;  %vm56_vm0 = vcmask 326656   ;;  %s299_s29 = smov [#allocation5]  }
  0x15   :  { %245 = vset.pattern.permute.xlu0 %v298_v1  ;;  %v223_v5 = vpack.c.bf16 %v35_v3, %v31_v2  ;;  %v34_v8 = vld [vmem:[#allocation2 + $0x20] sm:$0xff]  ;;  %v231_v9 = vpack.c.bf16 %v37_v6, %v33_v4  ;;  %v32_v11 = vld [vmem:[#allocation2 + $0x10] sm:$0xff]  ;;  %v39_v13 = vld [vmem:[#allocation2 + $0x48] sm:$0xff] }
  0x16   :  { %v225_v10 = vpack.c.bf16 %v34_v8, %v30_v7  ;;  %v36_v12 = vld [vmem:[#allocation2 + $0x30] sm:$0xff]  ;;  %v43_v15 = vld [vmem:[#allocation2 + $0x68] sm:$0xff]  ;;  %v41_v16 = vld [vmem:[#allocation2 + $0x58] sm:$0xff] }
  0x17   :  { %224 = vmatprep.subr.bf16.mxu0 %v223_v5  ;;  %v233_v14 = vpack.c.bf16 %v36_v12, %v32_v11  ;;  %v45_v17 = vld [vmem:[#allocation2 + $0x78] sm:$0xff]  ;;  %232 = vmatprep.subr.bf16.mxu1 %v231_v9  ;;  %v227_v18 = vpack.c.bf16 %v43_v15, %v39_v13  ;;  %v38_v20 = vld [vmem:[#allocation2 + $0x40] sm:$0xff]  ;;  %v40_v22 = vld [vmem:[#allocation2 + $0x50] sm:$0xff] }
  0x18   :  { %226 = vmatpush1.bf16.msra.mxu0 %v225_v10  ;;  %v235_v19 = vpack.c.bf16 %v45_v17, %v41_v16  ;;  %v42_v21 = vld [vmem:[#allocation2 + $0x60] sm:$0xff]  ;;  %v44_v24 = vld [vmem:[#allocation2 + $0x70] sm:$0xff]  ;;  %v47_v26 = vld [vmem:[#allocation2 + $0x88] sm:$0xff] }
  0x19   :  { %234 = vmatpush1.bf16.msra.mxu1 %v233_v14  ;;  %v229_v23 = vpack.c.bf16 %v42_v21, %v38_v20  ;;  %228 = vmatprep.subr.bf16.mxu0 %v227_v18  ;;  %v237_v25 = vpack.c.bf16 %v44_v24, %v40_v22  ;;  %v49_v27 = vld [vmem:[#allocation2 + $0x98] sm:$0xff]  ;;  %v50_v28 = vld [vmem:[%s352_s2] sm:$0xff]  ;;  %v48_v30 = vld [vmem:[#allocation2 + $0x90] sm:$0xff]  ;;  %s212_s2 = sshll.u32 %s299_s29, 4  ;;  %s213_s2 = int_to_ptr.vmem [resolvable:$true] %s212_s2 }
  0x1a   :  { %236 = vmatprep.subr.bf16.mxu1 %v235_v19  ;;  %53 = vperm.xlu0 %245, %v50_v28   ;;  %v46_v29 = vld [vmem:[#allocation2 + $0x80] sm:$0xff]  ;;  %p273_p9 = scmp.lt.s32.totalorder %s213_s2, %s213_s2 }
  0x1b   :  { %v29_v31 = vld [vmem:[%s351_s1] sm:$0xff]  ;;  %s268_s1 = scalar_lea.vmem %s213_s2, 512 }
  0x1c   :  { %230 = vmatpush1.bf16.msra.mxu0 %v229_v23  ;;  %p269_p8 = scmp.ne.s32.totalorder %s213_s2, %s268_s1  ;;  %p274_p10 = scmp.lt.s32.totalorder %s268_s1, %s268_s1 }
  0x1d   :  { %238 = vmatpush1.bf16.msra.mxu1 %v237_v25  ;;  %68 = vmatprep.subr.mxu0 %v47_v26 }
  0x1e   :  { %139 = vmatprep.subr.mxu1 %v49_v27  ;;  %p275_p11 = por %p274_p10, %p273_p9 }
  0x20   :  { %69 = vmatpush1.msra.mxu0 %v46_v29  ;;  %p276_p12 = pnand %p275_p11, %p269_p8 }
  0x21   :  { %140 = vmatpush1.msra.mxu1 %v48_v30  ;;  %221 = vmatmul.mubr.msk.f32.vlgmr.msra.gmra.mrb[0].mxu0 %vm56_vm0, %v29_v31 }
  0x22   :  { %222 = vmatmul.mubr.msk.f32.vlgmr.msra.gmra.mrb[0].mxu1 %vm56_vm0, %v29_v31 }
  0x99   :  { %v54_v32 = vpop.permute.xlu0 %53 }
  0xf4   :  { %v126_v33 = vpop.f32.mrb[0].mxu0 }
  0xf5   :  { %v127_v34 = vadd.f32 %v126_v33, %v54_v32  ;;  %v197_v35 = vpop.f32.mrb[0].mxu1  ;;  %v128_v36 = vpop.f32.mrb[1].mxu0 }
  0xf6   :  { %v198_v37 = vadd.f32 %v197_v35, %v54_v32  ;;  %v129_v38 = vadd.f32 %v128_v36, %v54_v32  ;;  %v199_v39 = vpop.f32.mrb[1].mxu1 }
  0xf7   :  { %202 = vst [vmem:[#allocation5] sm:$0xff] %v127_v34  ;;  %v200_v40 = vadd.f32 %v199_v39, %v54_v32 }
  0xf8   :  { %204 = vst [vmem:[#allocation5 + $0x10] sm:$0xff] %v198_v37  ;;  %203 = vst [vmem:[#allocation5 + $0x8] sm:$0xff] %v129_v38 }
  0xf9   :  { %205 = vst [vmem:[#allocation5 + $0x18] sm:$0xff] %v200_v40 }
  0xfa   :  { %279 = shalt.err (!%p276_p12)
}
  0xfb   :  { %s280_s5 = scalar_lea.hbm %s353_s3, 512 }
  0xfc   :  { %p281_p13 = scmp.ne.s32.totalorder %s353_s3, %s280_s5  ;;  %p284_p0 = scmp.lt.u32.totalorder %s280_s5, %s353_s3 }
  0xfe   :  { %p286_p1 = pnand %p284_p0, %p281_p13 }
 0x100   :  { %289 = shalt.err (!%p286_p1)
}
 0x101   :  { %215 = dma.vmem_to_hbm [thread:$0]  %s213_s2, 512, %s353_s3, [#allocation4]  }
 0x102   :  { %292 = dma.done.wait [#allocation4], 512  }
 0x103   :  { %293 = vsyncadd [#allocation4], 4294966784 }
 0x104   :  { %219 = vsyncpa [#allocation3], 1 }
 0x105   :  { %220 = vsyncpa [#allocation4], 1 }

</bundles_post_ra>
